<compile_context>
chip_gen: v7x
topology: tpu7x:2x2x1
jax: 0.10.0
libtpu: 0.0.40
codegen_flags: <defaults>
</compile_context>

<pallas_src>
import math
import numpy as np
import jax
import jax.numpy as jnp
from jax.experimental import pallas as pl
from jax.experimental.pallas import tpu as pltpu


def make_gamma_kernel(order: int, tau: float, hist_len: int) -> np.ndarray:
    """Discretized gamma kernel (order, tau), truncated to hist_len taps.

    Full support is ceil(3*tau) as in GammaDelay.init_config(); truncation to
    hist_len is equivalent to only hist_len frames of history having been
    observed (remaining circular-buffer slots are zero).
    """
    order = max(int(order), 1)
    full_len = int(math.ceil(3 * tau))
    t = np.arange(full_len, dtype=np.float64)
    k = ((order * t / tau) ** order) * np.exp(-order * t / tau) / (math.gamma(order) * tau)
    s = k.sum()
    if s > 0:
        k = k / s  # normalize over the full kernel support
    k = k[:hist_len]
    if k.shape[0] < hist_len:
        k = np.pad(k, (0, hist_len - k.shape[0]))
    return k.astype(np.float32)


def _make_medulla_kernel(k3: np.ndarray, k5: np.ndarray):
    """Build the kernel body with gamma weights baked in as constants."""
    T = int(k3.shape[0])
    k3f = [float(v) for v in np.asarray(k3, dtype=np.float64)]
    k5f = [float(v) for v in np.asarray(k5, dtype=np.float64)]

    def kernel(x_ref, out_ref):
        # x_ref: (T, tile) history block, lane-dense spatial axis.
        # out_ref: (6, tile) stacked output block.
        x0 = x_ref[0:1, :]
        off0 = jnp.maximum(-x0, 0.0)   # tm2 (OFF), current frame
        on0 = jnp.maximum(x0, 0.0)     # tm3 (ON),  current frame

        zero = jnp.zeros_like(x0)
        tm1p3 = off0 * k3f[0] if k3f[0] != 0.0 else zero
        mi1p3 = on0 * k3f[0] if k3f[0] != 0.0 else zero
        tm1p5 = off0 * k5f[0] if k5f[0] != 0.0 else zero
        mi1p5 = on0 * k5f[0] if k5f[0] != 0.0 else zero

        # Single streaming pass over the T history frames (T is small -> fully
        # unrolled at trace time; taps with zero weight in both kernels are
        # skipped at trace time).
        for t in range(1, T):
            if k3f[t] == 0.0 and k5f[t] == 0.0:
                continue
            xt = x_ref[t:t + 1, :]
            offt = jnp.maximum(-xt, 0.0)
            ont = jnp.maximum(xt, 0.0)
            if k3f[t] != 0.0:
                tm1p3 = tm1p3 + k3f[t] * offt
                mi1p3 = mi1p3 + k3f[t] * ont
            if k5f[t] != 0.0:
                tm1p5 = tm1p5 + k5f[t] * offt
                mi1p5 = mi1p5 + k5f[t] * ont

        # Opt order: [tm3, tm1Para3, mi1Para5, tm2, mi1Para3, tm1Para5]
        out_ref[0:1, :] = on0
        out_ref[1:2, :] = tm1p3
        out_ref[2:3, :] = mi1p5
        out_ref[3:4, :] = off0
        out_ref[4:5, :] = mi1p3
        out_ref[5:6, :] = tm1p5

    return kernel


def _round_up(v: int, m: int) -> int:
    return -(-v // m) * m


def _choose_tile(n: int, T: int,
                 vmem_budget_bytes: int = 12 << 20,
                 target_in_block_bytes: int = 512 << 10) -> int:
    """Pick a lane-dense spatial tile (multiple of 128).

    Targets ~512 KiB per (T, tile) input block (near the HBM roofline per the
    measured tile sweep) while keeping the double-buffered footprint
    [2 x (T, tile) inputs + 2 x (6, tile) outputs, f32] within the VMEM budget
    and bounding compiled code size.
    """
    n128 = _round_up(max(n, 1), 128)

    # Target block size.
    tile = max(128, (target_in_block_bytes // (max(T, 1) * 4)) // 128 * 128)

    # Double-buffered VMEM cap.
    per_col_bytes = (2 * T + 2 * 6) * 4
    cap = max(128, (vmem_budget_bytes // per_col_bytes) // 128 * 128)

    tile = min(tile, cap, n128)

    # Prefer >= 2 grid steps so the v7x megacore can shard the spatial axis.
    if tile >= n128 and n128 >= 256:
        tile = _round_up(n128 // 2, 128)
    return tile


def medulla_forward(medulla_history: jax.Array):
    """medulla_history: (T, H, W), index 0 = current frame, index t = t frames ago.

    Returns the 7-element Opt list:
      [tm3Signal, tm1Para3Signal, mi1Para5Signal, tm2Signal,
       mi1Para3Signal, tm1Para5Signal, hPara5Mi1.tau]
    """
    T, H, W = medulla_history.shape
    N = H * W

    # Deterministic "parameters": discretized gamma kernels from init_config().
    k3 = make_gamma_kernel(5, 10, T)    # hTm1 / hMi1
    k5 = make_gamma_kernel(25, 30, T)   # hPara5Tm1 / hPara5Mi1

    tile = _choose_tile(N, T)
    n_total = _round_up(N, tile)
    grid = (n_total // tile,)

    x = medulla_history.astype(jnp.float32).reshape(T, N)
    if n_total != N:
        x = jnp.pad(x, ((0, 0), (0, n_total - N)))

    cost = pl.CostEstimate(
        flops=6 * T * n_total,
        transcendentals=0,
        bytes_accessed=(T + 6) * n_total * 4,
    )

    out = pl.pallas_call(
        _make_medulla_kernel(k3, k5),
        out_shape=jax.ShapeDtypeStruct((6, n_total), jnp.float32),
        grid_spec=pltpu.PrefetchScalarGridSpec(
            num_scalar_prefetch=0,
            grid=grid,
            in_specs=[pl.BlockSpec((T, tile), lambda i: (0, i))],
            out_specs=pl.BlockSpec((6, tile), lambda i: (0, i)),
        ),
        compiler_params=pltpu.CompilerParams(
            dimension_semantics=("parallel",),
            vmem_limit_bytes=32 * 1024 * 1024,
        ),
        cost_estimate=cost,
    )(x)

    out = out[:, :N].reshape(6, H, W)
    tm3, tm1p3, mi1p5, tm2, mi1p3, tm1p5 = (out[i] for i in range(6))
    tau_para5 = jnp.float32(30.0)  # self.hPara5Mi1.tau
    return [tm3, tm1p3, mi1p5, tm2, mi1p3, tm1p5, tau_para5]


if __name__ == "__main__":
    key = jax.random.PRNGKey(0)
    T, H, W = 8, 16, 16  # 8 frames of temporal history, 16x16 spatial
    x_hist = jax.random.normal(key, (T, H, W), dtype=jnp.float32)

    opt = medulla_forward(x_hist)
    opt = jax.block_until_ready(opt)

    # Sanity checks against a plain-JAX reference of the same semantics.
    k3 = jnp.asarray(make_gamma_kernel(5, 10, T)).reshape(T, 1, 1)
    k5 = jnp.asarray(make_gamma_kernel(25, 30, T)).reshape(T, 1, 1)
    off = jnp.maximum(-x_hist, 0.0)
    on = jnp.maximum(x_hist, 0.0)
    ref = [on[0], jnp.sum(k3 * off, 0), jnp.sum(k5 * on, 0),
           off[0], jnp.sum(k3 * on, 0), jnp.sum(k5 * off, 0)]
    for got, want in zip(opt[:6], ref):
        assert got.shape == (H, W) and got.dtype == jnp.float32
        np.testing.assert_allclose(np.asarray(got), np.asarray(want), rtol=1e-5, atol=1e-6)
    assert float(opt[6]) == 30.0

    print("KERNEL_OK")
</pallas_src>

<mosaic_0001>
module attributes {stable_mosaic.version = 11 : i64} {
  func.func @kernel(%arg0: i32, %arg1: memref<8x128xf32, #tpu.memory_space<vmem>>, %arg2: memref<6x128xf32, #tpu.memory_space<vmem>>) attributes {dimension_semantics = [#tpu.dimension_semantics<parallel>], iteration_bounds = array<i64: 2>, scalar_prefetch = 0 : i64, scratch_operands = 0 : i64, tpu.core_type = #tpu.core_type<tc>, window_params = [{transform_indices = @transform_0, window_bounds = array<i64: 8, 128>}, {transform_indices = @transform_1, window_bounds = array<i64: 6, 128>}]} {
    %c0 = arith.constant 0 : index
    %c0_0 = arith.constant 0 : index
    %0 = vector.load %arg1[%c0, %c0_0] : memref<8x128xf32, #tpu.memory_space<vmem>>, vector<1x128xf32>
    %cst = arith.constant 0.000000e+00 : f32
    %1 = vector.broadcast %cst : f32 to vector<1x128xf32>
    %2 = arith.subf %1, %0 : vector<1x128xf32>
    %cst_1 = arith.constant 0.000000e+00 : f32
    %3 = vector.broadcast %cst_1 : f32 to vector<1x128xf32>
    %4 = arith.maximumf %2, %3 : vector<1x128xf32>
    %cst_2 = arith.constant 0.000000e+00 : f32
    %5 = vector.broadcast %cst_2 : f32 to vector<1x128xf32>
    %6 = arith.maximumf %0, %5 : vector<1x128xf32>
    %cst_3 = arith.constant 0.000000e+00 : f32
    %7 = vector.broadcast %cst_3 : f32 to vector<1x128xf32>
    %c1 = arith.constant 1 : index
    %c0_4 = arith.constant 0 : index
    %8 = vector.load %arg1[%c1, %c0_4] : memref<8x128xf32, #tpu.memory_space<vmem>>, vector<1x128xf32>
    %cst_5 = arith.constant 0.000000e+00 : f32
    %9 = vector.broadcast %cst_5 : f32 to vector<1x128xf32>
    %10 = arith.subf %9, %8 : vector<1x128xf32>
    %cst_6 = arith.constant 0.000000e+00 : f32
    %11 = vector.broadcast %cst_6 : f32 to vector<1x128xf32>
    %12 = arith.maximumf %10, %11 : vector<1x128xf32>
    %cst_7 = arith.constant 0.000000e+00 : f32
    %13 = vector.broadcast %cst_7 : f32 to vector<1x128xf32>
    %14 = arith.maximumf %8, %13 : vector<1x128xf32>
    %cst_8 = arith.constant 7.9237121E-5 : f32
    %15 = vector.broadcast %cst_8 : f32 to vector<1x128xf32>
    %16 = arith.mulf %15, %12 : vector<1x128xf32>
    %17 = arith.addf %7, %16 : vector<1x128xf32>
    %cst_9 = arith.constant 7.9237121E-5 : f32
    %18 = vector.broadcast %cst_9 : f32 to vector<1x128xf32>
    %19 = arith.mulf %18, %14 : vector<1x128xf32>
    %20 = arith.addf %7, %19 : vector<1x128xf32>
    %cst_10 = arith.constant 2.44754038E-28 : f32
    %21 = vector.broadcast %cst_10 : f32 to vector<1x128xf32>
    %22 = arith.mulf %21, %12 : vector<1x128xf32>
    %23 = arith.addf %7, %22 : vector<1x128xf32>
    %cst_11 = arith.constant 2.44754038E-28 : f32
    %24 = vector.broadcast %cst_11 : f32 to vector<1x128xf32>
    %25 = arith.mulf %24, %14 : vector<1x128xf32>
    %26 = arith.addf %7, %25 : vector<1x128xf32>
    %c2 = arith.constant 2 : index
    %c0_12 = arith.constant 0 : index
    %27 = vector.load %arg1[%c2, %c0_12] : memref<8x128xf32, #tpu.memory_space<vmem>>, vector<1x128xf32>
    %cst_13 = arith.constant 0.000000e+00 : f32
    %28 = vector.broadcast %cst_13 : f32 to vector<1x128xf32>
    %29 = arith.subf %28, %27 : vector<1x128xf32>
    %cst_14 = arith.constant 0.000000e+00 : f32
    %30 = vector.broadcast %cst_14 : f32 to vector<1x128xf32>
    %31 = arith.maximumf %29, %30 : vector<1x128xf32>
    %cst_15 = arith.constant 0.000000e+00 : f32
    %32 = vector.broadcast %cst_15 : f32 to vector<1x128xf32>
    %33 = arith.maximumf %27, %32 : vector<1x128xf32>
    %cst_16 = arith.constant 0.00153791171 : f32
    %34 = vector.broadcast %cst_16 : f32 to vector<1x128xf32>
    %35 = arith.mulf %34, %31 : vector<1x128xf32>
    %36 = arith.addf %17, %35 : vector<1x128xf32>
    %cst_17 = arith.constant 0.00153791171 : f32
    %37 = vector.broadcast %cst_17 : f32 to vector<1x128xf32>
    %38 = arith.mulf %37, %33 : vector<1x128xf32>
    %39 = arith.addf %20, %38 : vector<1x128xf32>
    %cst_18 = arith.constant 3.56917368E-21 : f32
    %40 = vector.broadcast %cst_18 : f32 to vector<1x128xf32>
    %41 = arith.mulf %40, %31 : vector<1x128xf32>
    %42 = arith.addf %23, %41 : vector<1x128xf32>
    %cst_19 = arith.constant 3.56917368E-21 : f32
    %43 = vector.broadcast %cst_19 : f32 to vector<1x128xf32>
    %44 = arith.mulf %43, %33 : vector<1x128xf32>
    %45 = arith.addf %26, %44 : vector<1x128xf32>
    %c3 = arith.constant 3 : index
    %c0_20 = arith.constant 0 : index
    %46 = vector.load %arg1[%c3, %c0_20] : memref<8x128xf32, #tpu.memory_space<vmem>>, vector<1x128xf32>
    %cst_21 = arith.constant 0.000000e+00 : f32
    %47 = vector.broadcast %cst_21 : f32 to vector<1x128xf32>
    %48 = arith.subf %47, %46 : vector<1x128xf32>
    %cst_22 = arith.constant 0.000000e+00 : f32
    %49 = vector.broadcast %cst_22 : f32 to vector<1x128xf32>
    %50 = arith.maximumf %48, %49 : vector<1x128xf32>
    %cst_23 = arith.constant 0.000000e+00 : f32
    %51 = vector.broadcast %cst_23 : f32 to vector<1x128xf32>
    %52 = arith.maximumf %46, %51 : vector<1x128xf32>
    %cst_24 = arith.constant 0.00708337873 : f32
    %53 = vector.broadcast %cst_24 : f32 to vector<1x128xf32>
    %54 = arith.mulf %53, %50 : vector<1x128xf32>
    %55 = arith.addf %36, %54 : vector<1x128xf32>
    %cst_25 = arith.constant 0.00708337873 : f32
    %56 = vector.broadcast %cst_25 : f32 to vector<1x128xf32>
    %57 = arith.mulf %56, %52 : vector<1x128xf32>
    %58 = arith.addf %39, %57 : vector<1x128xf32>
    %cst_26 = arith.constant 3.91685141E-17 : f32
    %59 = vector.broadcast %cst_26 : f32 to vector<1x128xf32>
    %60 = arith.mulf %59, %50 : vector<1x128xf32>
    %61 = arith.addf %42, %60 : vector<1x128xf32>
    %cst_27 = arith.constant 3.91685141E-17 : f32
    %62 = vector.broadcast %cst_27 : f32 to vector<1x128xf32>
    %63 = arith.mulf %62, %52 : vector<1x128xf32>
    %64 = arith.addf %45, %63 : vector<1x128xf32>
    %c4 = arith.constant 4 : index
    %c0_28 = arith.constant 0 : index
    %65 = vector.load %arg1[%c4, %c0_28] : memref<8x128xf32, #tpu.memory_space<vmem>>, vector<1x128xf32>
    %cst_29 = arith.constant 0.000000e+00 : f32
    %66 = vector.broadcast %cst_29 : f32 to vector<1x128xf32>
    %67 = arith.subf %66, %65 : vector<1x128xf32>
    %cst_30 = arith.constant 0.000000e+00 : f32
    %68 = vector.broadcast %cst_30 : f32 to vector<1x128xf32>
    %69 = arith.maximumf %67, %68 : vector<1x128xf32>
    %cst_31 = arith.constant 0.000000e+00 : f32
    %70 = vector.broadcast %cst_31 : f32 to vector<1x128xf32>
    %71 = arith.maximumf %65, %70 : vector<1x128xf32>
    %cst_32 = arith.constant 0.018104516 : f32
    %72 = vector.broadcast %cst_32 : f32 to vector<1x128xf32>
    %73 = arith.mulf %72, %69 : vector<1x128xf32>
    %74 = arith.addf %55, %73 : vector<1x128xf32>
    %cst_33 = arith.constant 0.018104516 : f32
    %75 = vector.broadcast %cst_33 : f32 to vector<1x128xf32>
    %76 = arith.mulf %75, %71 : vector<1x128xf32>
    %77 = arith.addf %58, %76 : vector<1x128xf32>
    %cst_34 = arith.constant 2.26200437E-14 : f32
    %78 = vector.broadcast %cst_34 : f32 to vector<1x128xf32>
    %79 = arith.mulf %78, %69 : vector<1x128xf32>
    %80 = arith.addf %61, %79 : vector<1x128xf32>
    %cst_35 = arith.constant 2.26200437E-14 : f32
    %81 = vector.broadcast %cst_35 : f32 to vector<1x128xf32>
    %82 = arith.mulf %81, %71 : vector<1x128xf32>
    %83 = arith.addf %64, %82 : vector<1x128xf32>
    %c5 = arith.constant 5 : index
    %c0_36 = arith.constant 0 : index
    %84 = vector.load %arg1[%c5, %c0_36] : memref<8x128xf32, #tpu.memory_space<vmem>>, vector<1x128xf32>
    %cst_37 = arith.constant 0.000000e+00 : f32
    %85 = vector.broadcast %cst_37 : f32 to vector<1x128xf32>
    %86 = arith.subf %85, %84 : vector<1x128xf32>
    %cst_38 = arith.constant 0.000000e+00 : f32
    %87 = vector.broadcast %cst_38 : f32 to vector<1x128xf32>
    %88 = arith.maximumf %86, %87 : vector<1x128xf32>
    %cst_39 = arith.constant 0.000000e+00 : f32
    %89 = vector.broadcast %cst_39 : f32 to vector<1x128xf32>
    %90 = arith.maximumf %84, %89 : vector<1x128xf32>
    %cst_40 = arith.constant 0.0335111804 : f32
    %91 = vector.broadcast %cst_40 : f32 to vector<1x128xf32>
    %92 = arith.mulf %91, %88 : vector<1x128xf32>
    %93 = arith.addf %74, %92 : vector<1x128xf32>
    %cst_41 = arith.constant 0.0335111804 : f32
    %94 = vector.broadcast %cst_41 : f32 to vector<1x128xf32>
    %95 = arith.mulf %94, %90 : vector<1x128xf32>
    %96 = arith.addf %77, %95 : vector<1x128xf32>
    %cst_42 = arith.constant 2.60214615E-12 : f32
    %97 = vector.broadcast %cst_42 : f32 to vector<1x128xf32>
    %98 = arith.mulf %97, %88 : vector<1x128xf32>
    %99 = arith.addf %80, %98 : vector<1x128xf32>
    %cst_43 = arith.constant 2.60214615E-12 : f32
    %100 = vector.broadcast %cst_43 : f32 to vector<1x128xf32>
    %101 = arith.mulf %100, %90 : vector<1x128xf32>
    %102 = arith.addf %83, %101 : vector<1x128xf32>
    %c6 = arith.constant 6 : index
    %c0_44 = arith.constant 0 : index
    %103 = vector.load %arg1[%c6, %c0_44] : memref<8x128xf32, #tpu.memory_space<vmem>>, vector<1x128xf32>
    %cst_45 = arith.constant 0.000000e+00 : f32
    %104 = vector.broadcast %cst_45 : f32 to vector<1x128xf32>
    %105 = arith.subf %104, %103 : vector<1x128xf32>
    %cst_46 = arith.constant 0.000000e+00 : f32
    %106 = vector.broadcast %cst_46 : f32 to vector<1x128xf32>
    %107 = arith.maximumf %105, %106 : vector<1x128xf32>
    %cst_47 = arith.constant 0.000000e+00 : f32
    %108 = vector.broadcast %cst_47 : f32 to vector<1x128xf32>
    %109 = arith.maximumf %103, %108 : vector<1x128xf32>
    %cst_48 = arith.constant 0.0505764931 : f32
    %110 = vector.broadcast %cst_48 : f32 to vector<1x128xf32>
    %111 = arith.mulf %110, %107 : vector<1x128xf32>
    %112 = arith.addf %93, %111 : vector<1x128xf32>
    %cst_49 = arith.constant 0.0505764931 : f32
    %113 = vector.broadcast %cst_49 : f32 to vector<1x128xf32>
    %114 = arith.mulf %113, %109 : vector<1x128xf32>
    %115 = arith.addf %96, %114 : vector<1x128xf32>
    %cst_50 = arith.constant 1.07882446E-10 : f32
    %116 = vector.broadcast %cst_50 : f32 to vector<1x128xf32>
    %117 = arith.mulf %116, %107 : vector<1x128xf32>
    %118 = arith.addf %99, %117 : vector<1x128xf32>
    %cst_51 = arith.constant 1.07882446E-10 : f32
    %119 = vector.broadcast %cst_51 : f32 to vector<1x128xf32>
    %120 = arith.mulf %119, %109 : vector<1x128xf32>
    %121 = arith.addf %102, %120 : vector<1x128xf32>
    %c7 = arith.constant 7 : index
    %c0_52 = arith.constant 0 : index
    %122 = vector.load %arg1[%c7, %c0_52] : memref<8x128xf32, #tpu.memory_space<vmem>>, vector<1x128xf32>
    %cst_53 = arith.constant 0.000000e+00 : f32
    %123 = vector.broadcast %cst_53 : f32 to vector<1x128xf32>
    %124 = arith.subf %123, %122 : vector<1x128xf32>
    %cst_54 = arith.constant 0.000000e+00 : f32
    %125 = vector.broadcast %cst_54 : f32 to vector<1x128xf32>
    %126 = arith.maximumf %124, %125 : vector<1x128xf32>
    %cst_55 = arith.constant 0.000000e+00 : f32
    %127 = vector.broadcast %cst_55 : f32 to vector<1x128xf32>
    %128 = arith.maximumf %122, %127 : vector<1x128xf32>
    %cst_56 = arith.constant 0.0663033425 : f32
    %129 = vector.broadcast %cst_56 : f32 to vector<1x128xf32>
    %130 = arith.mulf %129, %126 : vector<1x128xf32>
    %131 = arith.addf %112, %130 : vector<1x128xf32>
    %cst_57 = arith.constant 0.0663033425 : f32
    %132 = vector.broadcast %cst_57 : f32 to vector<1x128xf32>
    %133 = arith.mulf %132, %128 : vector<1x128xf32>
    %134 = arith.addf %115, %133 : vector<1x128xf32>
    %cst_58 = arith.constant 2.21160956E-9 : f32
    %135 = vector.broadcast %cst_58 : f32 to vector<1x128xf32>
    %136 = arith.mulf %135, %126 : vector<1x128xf32>
    %137 = arith.addf %118, %136 : vector<1x128xf32>
    %cst_59 = arith.constant 2.21160956E-9 : f32
    %138 = vector.broadcast %cst_59 : f32 to vector<1x128xf32>
    %139 = arith.mulf %138, %128 : vector<1x128xf32>
    %140 = arith.addf %121, %139 : vector<1x128xf32>
    %c0_60 = arith.constant 0 : index
    %c0_61 = arith.constant 0 : index
    %141 = vector.load %arg2[%c0_60, %c0_61] : memref<6x128xf32, #tpu.memory_space<vmem>>, vector<1x128xf32>
    tpu.vector_store %arg2[%c0_60, %c0_61], %6 {strides = array<i32>} : memref<6x128xf32, #tpu.memory_space<vmem>>, vector<1x128xf32>,
    %c1_62 = arith.constant 1 : index
    %c0_63 = arith.constant 0 : index
    %142 = vector.load %arg2[%c1_62, %c0_63] : memref<6x128xf32, #tpu.memory_space<vmem>>, vector<1x128xf32>
    tpu.vector_store %arg2[%c1_62, %c0_63], %131 {strides = array<i32>} : memref<6x128xf32, #tpu.memory_space<vmem>>, vector<1x128xf32>,
    %c2_64 = arith.constant 2 : index
    %c0_65 = arith.constant 0 : index
    %143 = vector.load %arg2[%c2_64, %c0_65] : memref<6x128xf32, #tpu.memory_space<vmem>>, vector<1x128xf32>
    tpu.vector_store %arg2[%c2_64, %c0_65], %140 {strides = array<i32>} : memref<6x128xf32, #tpu.memory_space<vmem>>, vector<1x128xf32>,
    %c3_66 = arith.constant 3 : index
    %c0_67 = arith.constant 0 : index
    %144 = vector.load %arg2[%c3_66, %c0_67] : memref<6x128xf32, #tpu.memory_space<vmem>>, vector<1x128xf32>
    tpu.vector_store %arg2[%c3_66, %c0_67], %4 {strides = array<i32>} : memref<6x128xf32, #tpu.memory_space<vmem>>, vector<1x128xf32>,
    %c4_68 = arith.constant 4 : index
    %c0_69 = arith.constant 0 : index
    %145 = vector.load %arg2[%c4_68, %c0_69] : memref<6x128xf32, #tpu.memory_space<vmem>>, vector<1x128xf32>
    tpu.vector_store %arg2[%c4_68, %c0_69], %134 {strides = array<i32>} : memref<6x128xf32, #tpu.memory_space<vmem>>, vector<1x128xf32>,
    %c5_70 = arith.constant 5 : index
    %c0_71 = arith.constant 0 : index
    %146 = vector.load %arg2[%c5_70, %c0_71] : memref<6x128xf32, #tpu.memory_space<vmem>>, vector<1x128xf32>
    tpu.vector_store %arg2[%c5_70, %c0_71], %137 {strides = array<i32>} : memref<6x128xf32, #tpu.memory_space<vmem>>, vector<1x128xf32>,
    return
  }
  func.func @transform_0(%arg0: i32) -> (i32, i32) {
    %c0_i32 = arith.constant 0 : i32
    %c0_i32_0 = arith.constant 0 : i32
    return %c0_i32, %arg0 : i32, i32
  }
  func.func @transform_1(%arg0: i32) -> (i32, i32) {
    %c0_i32 = arith.constant 0 : i32
    %c0_i32_0 = arith.constant 0 : i32
    return %c0_i32, %arg0 : i32, i32
  }
}

</mosaic_0001>

<bundles_post_ra>
// kernel: tpu_custom_call.1
= control target key start
LH: loop header
LB: loop body
LE: loop exit
PB: predicated region body
PF: predicated region fallthrough
CT: control target
= control target key end

     0   :  { %6 = vsyncpa [#allocation3], 0  ;;  %s648_s0 = inlined_call_operand.hbm [shape: f32[8,256], index: 0, kind: input, shape index: {}]   ;;  %s649_s1 = inlined_call_operand.hbm [shape: f32[6,256], index: 1, kind: output, shape index: {}]  }
   0x1   :  { %8 = vsyncpa [#allocation3 + $0x1], 0 }
   0x2   :  { %9 = vsyncpa [#allocation4], 0 }
   0x3   :  { %11 = vsyncpa [#allocation4 + $0x1], 0  ;;  %s478_s6 = smov 0   ;;  %s480_s7 = smov 0  }
   0x4   :  { %s482_s8 = smov 0   ;;  %s484_s9 = smov 0  }
   0x5 LB: > { %s499_s10 = sadd.s32 4294967295, %s464_s9   ;;  %s310_s11 = sadd.s32 4294967294, %s464_s9   ;;  %s464_s9 = sphi %s484_s9, %s664_s9   ;;  %s460_s8 = sphi %s482_s8, %s663_s8   ;;  %s456_s7 = sphi %s480_s7, %s662_s7   ;;  %s452_s6 = sphi %s478_s6, %s661_s6  }
   0x6   : > { %s503_s12 = sadd.s32 1, %s464_s9   ;;  %s24_s13 = sadd.s32 1, %s460_s8 }
   0x7   : > { %s21_s14 = ssub.s32 %s464_s9, %s503_s12  ;;  %p31_p0 = scmp.ne.s32.totalorder %s460_s8, %s456_s7 }
   0x8   : > { %p22_p1 = scmp.eq.s32.totalorder %s21_s14, 0  ;;  %p32_p2 = scmp.eq.s32.totalorder %s464_s9, 0 }
   0x9   : > { %p37_p3 = scmp.ne.s32.totalorder %s456_s7, %s452_s6  ;;  %p38_p4 = scmp.eq.s32.totalorder %s499_s10, 0 }
   0xa   : > { %s515_s15 = scalar_select %p22_p1, %s460_s8, %s24_s13  }
   0xb   : > { %p517_p5 = por %p32_p2, %p31_p0  ;;  %p521_p6 = por %p38_p4, %p37_p3 }
   0xc   : > { %p61_p7 = scmp.eq.s32.totalorder %s499_s10, 1  ;;  %p67_p8 = scmp.eq.s32.totalorder %s310_s11, 1 }
   0xd   : > { %p334_p10 = scmp.lt.s32.totalorder %s464_s9, 2  ;;  %s87_s20 = sand.u32 1, %s460_s8  }
   0xe   : > { %p528_p11 = por %p61_p7, %p31_p0  ;;  %p532_p12 = por %p67_p8, %p37_p3 }
   0xf   : > { %s314_s21 = sshll.u32 %s464_s9, 7  ;;  %s313_s22 = sshll.u32 %s87_s20, 3 }
  0x10   : > { %s653_s18 = scalar_select %p528_p11, 1, 0 }
  0x11   : > { %s654_s19 = scalar_select %p532_p12, 1, 0 }
  0x12   : > { %s541_s25 = scalar_lea.hbm %s648_s0, %s314_s21  ;;  %s91_s26 = scalar_lea.vmem [#allocation2], %s313_s22 }
  0x13   : > { %s98_s27 = sshll.u32 %s91_s26, 4  ;;  %p545_p13 = pnand %p334_p10, %p517_p5  ;;  %s549_s27 = int_to_ptr.vmem [resolvable:$true] %s98_s27 }
  0x14   : > { %s88_s29 = scalar_lea.sflag [#allocation3], %s87_s20  ;;  %s368_s30 = scalar_lea.hbm %s541_s25, 128 }
  0x15   : > { %p369_p2 = scmp.ne.s32.totalorder %s541_s25, %s368_s30  ;;  %p370_p3 = pneg %p545_p13 }
  0x16   : > { %s373_s4 = scalar_lea.hbm %s648_s0, 256  ;;  %p374_p5 = scmp.lt.u32.totalorder %s541_s25, %s648_s0 }
  0x17   : > { %p371_p4 = pnand %p370_p3, %p369_p2  ;;  %p375_p8 = scmp.lt.u32.totalorder %s373_s4, %s368_s30 }
  0x18   : > { %p377_p9 = scmp.lt.u32.totalorder %s368_s30, %s541_s25 }
  0x19   : > { %p372_p7 = pneg %p371_p4  ;;  %p376_p10 = por %p375_p8, %p374_p5 }
  0x1b   : > { %p378_p0 = por %p377_p9, %p376_p10 }
  0x1d   : > { %p379_p1 = pnand %p378_p0, %p372_p7 }
  0x1f   : > { %382 = shalt.err (!%p379_p1)
}
  0x20   : > { %s383_s13 = scalar_lea.vmem %s549_s27, 128  ;;  %s466_s14 = smov [#allocation2]  }
  0x21   : > { %p384_p2 = scmp.ne.s32.totalorder %s549_s27, %s383_s13  ;;  %s388_s16 = sshll.u32 %s466_s14, 4  ;;  %s389_s16 = int_to_ptr.vmem [resolvable:$false] %s388_s16 }
  0x22   : > { %s390_s20 = scalar_lea.vmem %s389_s16, 256  ;;  %p391_p11 = scmp.lt.s32.totalorder %s549_s27, %s389_s16 }
  0x23   : > { %p386_p4 = pnand %p384_p2, %p370_p3  ;;  %p392_p5 = scmp.lt.s32.totalorder %s390_s20, %s383_s13 }
  0x25   : > { %p387_p12 = pneg %p386_p4  ;;  %p393_p8 = por %p392_p5, %p391_p11 }
  0x27   : > { %p394_p9 = pnand %p393_p8, %p387_p12 }
  0x29   : > { %397 = shalt.err (!%p394_p9)
}
  0x2a   : > { %329 = dma.hbm_to_vmem [thread:$0]  (!%p545_p13), %s541_s25, 128, %s549_s27, %s88_s29  }
  0x2b   : > { %p656_p0 = scmp.lt.s32.totalorder %s464_s9, 3  ;;  %p657_p1 = scmp.ge.s32.totalorder %s464_s9, 1 }
  0x2d   : > { %p104_p3 = pnand %p657_p1, %p656_p0 }
  0x2e   : > { %s583_s21 = sand.u32 (!%p104_p3), 1, %s456_s7  }
  0x2f   : > { %107 = sbr.rel (%p104_p3) target bundleno = 97 (0x61), region = 24  ;;  %s316_s22 = sshll.u32 (!%p104_p3), %s583_s21, 3 }
  0x30   : > { %s110_s23 = scalar_lea.sflag (!%p104_p3), [#allocation3], %s583_s21  ;;  %s113_s24 = scalar_lea.vmem (!%p104_p3), [#allocation2], %s316_s22 }
  0x36   : > { %443 = dma.done.wait (%p521_p6), %s110_s23, 128  }
  0x37   : > { %445 = vsyncadd (%p521_p6), %s110_s23, 4294967168  ;;  %v132_v0 = vld [vmem:[%s113_s24] sm:$0x1]  ;;  %v136_v1 = vld [vmem:[%s113_s24 + $0x1] sm:$0x1]  ;;  %s591_s25 = scalar_lea.vmem [#allocation5], %s316_s22 }
  0x38   : > { %v148_v2 = vld [vmem:[%s113_s24 + $0x2] sm:$0x1]  ;;  %v135_v3 = vmax.f32 %v132_v0, 0.0  ;;  %v137_v4 = vsub.f32 0.0, %v136_v1  ;;  %v160_v6 = vld [vmem:[%s113_s24 + $0x3] sm:$0x1] }
  0x39   : > { %v149_v5 = vsub.f32 0.0, %v148_v2  ;;  %v139_v7 = vmax.f32 %v136_v1, 0.0  ;;  %v161_v8 = vsub.f32 0.0, %v160_v6  ;;  %v172_v9 = vld [vmem:[%s113_s24 + $0x4] sm:$0x1]  ;;  %v151_v11 = vmax.f32 %v148_v2, 0.0 }
  0x3a   : > { %v184_v10 = vld [vmem:[%s113_s24 + $0x5] sm:$0x1]  ;;  %220 = vst [vmem:[%s591_s25] sm:$0x1] %v135_v3  ;;  %v138_v12 = vmax.f32 %v137_v4, 0.0  ;;  %v173_v14 = vsub.f32 0.0, %v172_v9  ;;  %v163_v31 = vmax.f32 %v160_v6, 0.0 }
  0x3b   : > { %v150_v13 = vmax.f32 %v149_v5, 0.0  ;;  %v185_v15 = vsub.f32 0.0, %v184_v10  ;;  %v196_v16 = vld [vmem:[%s113_s24 + $0x6] sm:$0x1]  ;;  %v162_v17 = vmax.f32 %v161_v8, 0.0  ;;  %v175_v35 = vmax.f32 %v172_v9, 0.0 }
  0x3c   : > { %v197_v18 = vsub.f32 0.0, %v196_v16  ;;  %v208_v19 = vld [vmem:[%s113_s24 + $0x7] sm:$0x1]  ;;  %v146_v20 = vmul.f32 2.4475404e-28, %v139_v7  ;;  %v174_v23 = vmax.f32 %v173_v14, 0.0 }
  0x3d   : > { %v140_v21 = vmul.f32 7.923712e-05, %v138_v12  ;;  %v152_v22 = vmul.f32 0.0015379117, %v150_v13  ;;  %v186_v24 = vmax.f32 %v185_v15, 0.0  ;;  %v209_v27 = vsub.f32 0.0, %v208_v19 }
  0x3e   : > { %v164_v25 = vmul.f32 0.0070833787, %v162_v17  ;;  %v198_v26 = vmax.f32 %v197_v18, 0.0  ;;  %v158_v28 = vmul.f32 3.5691737e-21, %v151_v11  ;;  %v187_v38 = vmax.f32 %v184_v10, 0.0 }
  0x3f   : > { %v153_v29 = vadd.f32 %v152_v22, %v140_v21  ;;  %v176_v30 = vmul.f32 0.018104516, %v174_v23  ;;  %v188_v32 = vmul.f32 0.03351118, %v186_v24  ;;  %v210_v33 = vmax.f32 %v209_v27, 0.0  ;;  %s240_s17 = sshll.u32 %s591_s25, 4  ;;  %s600_s17 = int_to_ptr.vmem [resolvable:$true] %s240_s17 }
  0x40   : > { %v159_v34 = vadd.f32 %v158_v28, %v146_v20  ;;  %v170_v37 = vmul.f32 3.9168514e-17, %v163_v31  ;;  %v199_v39 = vmax.f32 %v196_v16, 0.0  ;;  %v200_v40 = vmul.f32 0.050576493, %v198_v26  ;;  %s319_s26 = sshll.u32 %s499_s10, 7 }
  0x41   : > { %v165_v36 = vadd.f32 %v164_v25, %v153_v29  ;;  %v182_v41 = vmul.f32 2.2620044e-14, %v175_v35  ;;  %v211_v42 = vmax.f32 %v208_v19, 0.0  ;;  %v133_v43 = vsub.f32 0.0, %v132_v0  ;;  %s605_s29 = scalar_lea.hbm %s649_s1, %s319_s26  ;;  %s227_s30 = scalar_lea.sflag [#allocation4], %s583_s21 }
  0x42   : > { %v212_v45 = vmul.f32 0.06630334, %v210_v33  ;;  %v171_v46 = vadd.f32 %v170_v37, %v159_v34  ;;  %v194_v47 = vmul.f32 2.6021461e-12, %v187_v38  ;;  %v206_v48 = vmul.f32 1.07882446e-10, %v199_v39 }
  0x43   : > { %v177_v44 = vadd.f32 %v176_v30, %v165_v36  ;;  %v134_v49 = vmax.f32 %v133_v43, 0.0  ;;  %v142_v50 = vmul.f32 7.923712e-05, %v139_v7  ;;  %v154_v53 = vmul.f32 0.0015379117, %v151_v11  ;;  %s398_s2 = scalar_lea.vmem %s600_s17, 128 }
  0x44   : > { %v183_v52 = vadd.f32 %v182_v41, %v171_v46  ;;  %v166_v54 = vmul.f32 0.0070833787, %v163_v31  ;;  %v218_v55 = vmul.f32 2.2116096e-09, %v211_v42  ;;  %v178_v59 = vmul.f32 0.018104516, %v175_v35  ;;  %p399_p6 = scmp.ne.s32.totalorder %s600_s17, %s398_s2 }
  0x45   : > { %v189_v51 = vadd.f32 %v188_v32, %v177_v44  ;;  %223 = vst [vmem:[%s591_s25 + $0x3] sm:$0x1] %v134_v49  ;;  %v155_v58 = vadd.f32 %v154_v53, %v142_v50  ;;  %v144_v60 = vmul.f32 2.4475404e-28, %v138_v12  ;;  %v156_v61 = vmul.f32 3.5691737e-21, %v150_v13 }
  0x46   : > { %v195_v57 = vadd.f32 %v194_v47, %v183_v52  ;;  %v168_v62 = vmul.f32 3.9168514e-17, %v162_v17  ;;  %v190_v2 = vmul.f32 0.03351118, %v187_v38  ;;  %v180_v4 = vmul.f32 2.2620044e-14, %v174_v23 }
  0x47   : > { %v201_v56 = vadd.f32 %v200_v40, %v189_v51  ;;  %v167_v1 = vadd.f32 %v166_v54, %v155_v58  ;;  %v157_v3 = vadd.f32 %v156_v61, %v144_v60  ;;  %v202_v7 = vmul.f32 0.050576493, %v199_v39  ;;  %p658_p11 = scmp.ne.s32.totalorder %s653_s18, 0  ;;  %s467_s10 = smov [#allocation5]  }
  0x48   : > { %v207_v0 = vadd.f32 %v206_v48, %v195_v57  ;;  %v192_v9 = vmul.f32 2.6021461e-12, %v186_v24  ;;  %v214_v11 = vmul.f32 0.06630334, %v211_v42  ;;  %v204_v13 = vmul.f32 1.07882446e-10, %v198_v26 }
  0x49   : > { %v213_v63 = vadd.f32 %v212_v45, %v201_v56  ;;  %v179_v6 = vadd.f32 %v178_v59, %v167_v1  ;;  %v169_v8 = vadd.f32 %v168_v62, %v157_v3  ;;  %v216_v16 = vmul.f32 2.2116096e-09, %v210_v33  ;;  %p400_p12 = pnand %p399_p6, %p658_p11  ;;  %s402_s3 = sshll.u32 %s467_s10, 4  ;;  %s403_s3 = int_to_ptr.vmem [resolvable:$false] %s402_s3 }
  0x4a   : > { %v219_v5 = vadd.f32 %v218_v55, %v207_v0  ;;  %s404_s4 = scalar_lea.vmem %s403_s3, 256  ;;  %p405_p7 = scmp.lt.s32.totalorder %s600_s17, %s403_s3 }
  0x4b   : > { %221 = vst [vmem:[%s591_s25 + $0x1] sm:$0x1] %v213_v63  ;;  %v191_v10 = vadd.f32 %v190_v2, %v179_v6  ;;  %v181_v12 = vadd.f32 %v180_v4, %v169_v8  ;;  %p401_p13 = pneg %p400_p12  ;;  %p406_p10 = scmp.lt.s32.totalorder %s404_s4, %s398_s2 }
  0x4c   : > { %222 = vst [vmem:[%s591_s25 + $0x2] sm:$0x1] %v219_v5 }
  0x4d   : > { %v203_v14 = vadd.f32 %v202_v7, %v191_v10  ;;  %v193_v15 = vadd.f32 %v192_v9, %v181_v12  ;;  %p407_p2 = por %p406_p10, %p405_p7 }
  0x4f   : > { %v215_v17 = vadd.f32 %v214_v11, %v203_v14  ;;  %v205_v18 = vadd.f32 %v204_v13, %v193_v15  ;;  %p408_p4 = pnand %p407_p2, %p401_p13 }
  0x51   : > { %224 = vst [vmem:[%s591_s25 + $0x4] sm:$0x1] %v215_v17  ;;  %v217_v19 = vadd.f32 %v216_v16, %v205_v18 }
  0x53   : > { %225 = vst [vmem:[%s591_s25 + $0x5] sm:$0x1] %v217_v19 }
  0x54   : > { %411 = shalt.err (!%p408_p4)
}
  0x55   : > { %s412_s5 = scalar_lea.hbm %s605_s29, 128  ;;  %s416_s14 = scalar_lea.hbm %s649_s1, 256 }
  0x56   : > { %p413_p5 = scmp.ne.s32.totalorder %s605_s29, %s412_s5  ;;  %p417_p0 = scmp.lt.u32.totalorder %s605_s29, %s649_s1 }
  0x57   : > { %p418_p1 = scmp.lt.u32.totalorder %s416_s14, %s412_s5  ;;  %p420_p6 = scmp.lt.u32.totalorder %s412_s5, %s605_s29 }
  0x58   : > { %p414_p8 = pnand %p413_p5, %p658_p11 }
  0x59   : > { %p419_p3 = por %p418_p1, %p417_p0 }
  0x5a   : > { %p415_p9 = pneg %p414_p8 }
  0x5b   : > { %p421_p12 = por %p420_p6, %p419_p3 }
  0x5d   : > { %p422_p13 = pnand %p421_p12, %p415_p9 }
  0x5f   : > { %425 = shalt.err (!%p422_p13)
}
  0x60   : > { %324 = dma.vmem_to_hbm [thread:$0]  (%p658_p11), %s600_s17, 128, %s605_s29, %s227_s30  }
  0x61 PF: > { %s252_s21 = sand.u32 1, %s452_s6   ;;  %p659_p7 = scmp.ne.s32.totalorder %s654_s19, 0 }
  0x62   : > { %p660_p10 = scmp.ge.s32.totalorder %s464_s9, 2  ;;  %s253_s22 = scalar_lea.sflag [#allocation4], %s252_s21 }
  0x64   : > { %p331_p2 = pnand %p660_p10, %p659_p7 }
  0x66   : > { %447 = dma.done.wait (!%p331_p2), %s253_s22, 128  }
  0x67   : > { %449 = vsyncadd (!%p331_p2), %s253_s22, 4294967168  ;;  %p14_p4 = scmp.ge.s32.totalorder %s503_s12, 4   ;;  %s661_s6 = smov %s456_s7 }
  0x68   : > { %s662_s7 = smov %s460_s8  ;;  %s663_s8 = smov %s515_s15 }
  0x69   : > { %s664_s9 = smov %s503_s12  ;;  %16 = sbr.rel (!%p14_p4) target bundleno = 5 (0x5), region = 69 }
  0x70   :  { %258 = vsyncpa [#allocation3], 1 }
  0x71   :  { %260 = vsyncpa [#allocation3 + $0x1], 1 }
  0x72   :  { %261 = vsyncpa [#allocation4], 1 }
  0x73   :  { %263 = vsyncpa [#allocation4 + $0x1], 1 }

</bundles_post_ra>
